<compile_context>
chip_gen: v7x
topology: tpu7x:2x2x1
jax: 0.10.0
libtpu: 0.0.40
codegen_flags: <defaults>
</compile_context>

<pallas_src>
import jax
import jax.numpy as jnp
from jax.experimental import pallas as pl
from jax.experimental.pallas import tpu as pltpu

_LANE = 128
_MIN_GRID_STEPS = 4           # keep >= 2 grid steps per TensorCore on v7x
_MIN_CAPPED_TILE_ROWS = 512   # never shrink tiles below this when capping


def _swish_kernel(x_ref, o_ref):
    # NOTE: on a masked partial last block the padding region of x_ref holds
    # uninitialized data; it flows through tanh and the masked store discards
    # it.  Harmless on TPU (no FP traps) -- do not "fix" this, it would only
    # add cost.
    x = x_ref[...]
    half = jnp.asarray(0.5, dtype=x.dtype)
    one = jnp.asarray(1.0, dtype=x.dtype)
    # sigmoid(x) = 0.5 * (tanh(0.5*x) + 1): a single EUP transcendental
    # instead of exp + divide.  Muls/adds run on the VPU.
    sig = half * (jnp.tanh(x * half) + one)
    o_ref[...] = x * sig


def _block_config():
    """Generation-aware (per-buffer block bytes, vmem_limit_bytes or None)."""
    try:
        cap = pltpu.get_tpu_info().vmem_capacity_bytes
    except Exception:
        cap = None
    try:
        kind = jax.devices()[0].device_kind.lower()
    except Exception:
        kind = ""

    if cap is None:
        # Unknown backend (e.g. interpret mode): conservative v5e-safe default.
        return 2 << 20, None
    if cap <= (64 << 20):
        # v7x-class (64 MiB VMEM per TC): 8 MiB/buffer -> 2 arrays x 2 pipeline
        # buffers = 32 MiB, under an explicit 48 MiB scoped limit.
        return 8 << 20, 48 << 20
    if "v5" in kind or "v4" in kind:
        # v5e/older: 2 MiB/buffer -> 8 MiB, under the 16 MiB scoped default.
        return 2 << 20, None
    # v6e-class (128 MiB physical): 6 MiB/buffer -> 24 MiB, explicit 32 MiB limit.
    return 6 << 20, 32 << 20


def _compiler_params(vmem_limit):
    return pltpu.CompilerParams(
        dimension_semantics=("parallel",),
        vmem_limit_bytes=vmem_limit,
    )


def _sublanes(dtype):
    # dtype-aware sublane granularity: 8 (f32), 16 (bf16/f16).
    itemsize = jnp.dtype(dtype).itemsize
    return max(8, 32 // itemsize)


def _swish_2d(x2d, *, donate=False):
    """Run the Pallas swish kernel on a lane-dense (rows, 128) slab."""
    rows, lane = x2d.shape
    dtype = x2d.dtype
    itemsize = jnp.dtype(dtype).itemsize
    sub = _sublanes(dtype)

    block_bytes, vmem_limit = _block_config()
    block_rows = max(sub, (block_bytes // (lane * itemsize)) // sub * sub)

    # Keep >= _MIN_GRID_STEPS grid steps on big inputs so the "parallel" grid
    # axis still has work to shard across both TensorCores on v7x.
    if rows >= _MIN_GRID_STEPS * _MIN_CAPPED_TILE_ROWS:
        cap_rows = max(sub, (rows // _MIN_GRID_STEPS) // sub * sub)
        block_rows = min(block_rows, cap_rows)

    if rows <= block_rows:
        # Full-extent block (exempt from the (8,128) divisibility rule).
        block_rows = rows

    grid = (pl.cdiv(rows, block_rows),)  # partial last block is masked

    return pl.pallas_call(
        _swish_kernel,
        out_shape=jax.ShapeDtypeStruct((rows, lane), dtype),
        grid=grid,
        in_specs=[pl.BlockSpec((block_rows, lane), lambda i: (i, 0))],
        out_specs=pl.BlockSpec((block_rows, lane), lambda i: (i, 0)),
        compiler_params=_compiler_params(vmem_limit),
        input_output_aliases=({0: 0} if donate else {}),
    )(x2d)


def _swish_1d(x_flat, *, donate=False):
    """Swish on a flat 1-D array (ragged sizes): masked partial last block,
    no concatenate / pad copies."""
    (total,) = x_flat.shape
    dtype = x_flat.dtype
    itemsize = jnp.dtype(dtype).itemsize
    chunk = _sublanes(dtype) * _LANE  # lane- and sublane-aligned granularity

    block_bytes, vmem_limit = _block_config()
    block_elems = max(chunk, (block_bytes // itemsize) // chunk * chunk)
    if total >= _MIN_GRID_STEPS * _MIN_CAPPED_TILE_ROWS * _LANE:
        cap_elems = max(chunk, (total // _MIN_GRID_STEPS) // chunk * chunk)
        block_elems = min(block_elems, cap_elems)
    if total <= block_elems:
        block_elems = total  # single full-extent block

    grid = (pl.cdiv(total, block_elems),)

    # TODO(synk): verify 1-D blocked lowering with pl.lower_as_mlir on every
    # target generation; fall back to the 2D path + single pad if it rejects.
    return pl.pallas_call(
        _swish_kernel,
        out_shape=jax.ShapeDtypeStruct((total,), dtype),
        grid=grid,
        in_specs=[pl.BlockSpec((block_elems,), lambda i: (i,))],
        out_specs=pl.BlockSpec((block_elems,), lambda i: (i,)),
        compiler_params=_compiler_params(vmem_limit),
        input_output_aliases=({0: 0} if donate else {}),
    )(x_flat)


def naive_swish(x, *, donate=False):
    """Elementwise swish matching _NaiveSwish.forward: x * sigmoid(x).

    Set donate=True (and donate x at a jit boundary) to alias the output onto
    the input buffer and halve peak HBM footprint.
    """
    if not jnp.issubdtype(x.dtype, jnp.floating):
        raise TypeError(f"naive_swish requires a floating dtype, got {x.dtype}")

    orig_shape = x.shape
    total = x.size
    if total == 0:
        return x

    x_flat = x.reshape(-1)

    if total % _LANE == 0:
        # Fast path (common case for conv activations): free reshape, no pad.
        out_flat = _swish_2d(
            x_flat.reshape(total // _LANE, _LANE), donate=donate
        ).reshape(-1)
    elif total >= 8 * _LANE:
        # Ragged sizes: one flat pallas_call with a masked partial last block.
        out_flat = _swish_1d(x_flat, donate=donate)
    else:
        # Tiny input (< 1024 elems): plain jnp is cheaper than a kernel launch.
        out_flat = x_flat * jax.nn.sigmoid(x_flat)

    return out_flat.reshape(orig_shape)


if __name__ == "__main__":
    key = jax.random.PRNGKey(0)
    # NCHW, consistent with PyTorch conv-style inputs.
    x = jax.random.normal(key, (2, 4, 16, 16), dtype=jnp.float32)

    y = naive_swish(x)
    jax.block_until_ready(y)

    # Reference check against plain JAX swish.
    y_ref = x * jax.nn.sigmoid(x)
    assert y.shape == x.shape and y.dtype == x.dtype
    assert jnp.allclose(y, y_ref, atol=1e-5, rtol=1e-5)

    # bf16 sanity check (tanh-form sigmoid differs by a few ulp in bf16, so
    # the tolerance is loosened accordingly).
    xb = x.astype(jnp.bfloat16)
    yb = naive_swish(xb)
    jax.block_until_ready(yb)
    yb_ref = (x * jax.nn.sigmoid(x)).astype(jnp.bfloat16)
    assert yb.shape == xb.shape and yb.dtype == jnp.bfloat16
    assert jnp.allclose(
        yb.astype(jnp.float32), yb_ref.astype(jnp.float32), atol=5e-2, rtol=5e-2
    )

    print("KERNEL_OK")
</pallas_src>

<mosaic_0001>
module attributes {stable_mosaic.version = 11 : i64} {
  func.func @_swish_kernel(%arg0: i32, %arg1: memref<16x128xf32, #tpu.memory_space<vmem>>, %arg2: memref<16x128xf32, #tpu.memory_space<vmem>>) attributes {dimension_semantics = [#tpu.dimension_semantics<parallel>], iteration_bounds = array<i64: 1>, scalar_prefetch = 0 : i64, scratch_operands = 0 : i64, tpu.core_type = #tpu.core_type<tc>, window_params = [{transform_indices = @transform_0, window_bounds = array<i64: 16, 128>}, {transform_indices = @transform_1, window_bounds = array<i64: 16, 128>}]} {
    %c0 = arith.constant 0 : index
    %c0_0 = arith.constant 0 : index
    %0 = vector.load %arg1[%c0, %c0_0] : memref<16x128xf32, #tpu.memory_space<vmem>>, vector<16x128xf32>
    %cst = arith.constant 5.000000e-01 : f32
    %1 = vector.broadcast %cst : f32 to vector<16x128xf32>
    %2 = arith.mulf %0, %1 : vector<16x128xf32>
    %3 = math.tanh %2 : vector<16x128xf32>
    %cst_1 = arith.constant 1.000000e+00 : f32
    %4 = vector.broadcast %cst_1 : f32 to vector<16x128xf32>
    %5 = arith.addf %3, %4 : vector<16x128xf32>
    %cst_2 = arith.constant 5.000000e-01 : f32
    %6 = vector.broadcast %cst_2 : f32 to vector<16x128xf32>
    %7 = arith.mulf %6, %5 : vector<16x128xf32>
    %8 = arith.mulf %0, %7 : vector<16x128xf32>
    %c0_3 = arith.constant 0 : index
    %c0_4 = arith.constant 0 : index
    %9 = vector.load %arg2[%c0_3, %c0_4] : memref<16x128xf32, #tpu.memory_space<vmem>>, vector<16x128xf32>
    tpu.vector_store %arg2[%c0_3, %c0_4], %8 {strides = array<i32>} : memref<16x128xf32, #tpu.memory_space<vmem>>, vector<16x128xf32>,
    return
  }
  func.func @transform_0(%arg0: i32) -> (i32, i32) {
    %c0_i32 = arith.constant 0 : i32
    %c0_i32_0 = arith.constant 0 : i32
    return %arg0, %c0_i32 : i32, i32
  }
  func.func @transform_1(%arg0: i32) -> (i32, i32) {
    %c0_i32 = arith.constant 0 : i32
    %c0_i32_0 = arith.constant 0 : i32
    return %arg0, %c0_i32 : i32, i32
  }
}

</mosaic_0001>

<bundles_post_ra>
// kernel: tpu_custom_call.1
= control target key start
LH: loop header
LB: loop body
LE: loop exit
PB: predicated region body
PF: predicated region fallthrough
CT: control target
= control target key end

     0   :  { %6 = vsyncpa [#allocation3], 0  ;;  %s154_s0 = inlined_call_operand.hbm [shape: f32[16,128], index: 0, kind: input, shape index: {}]   ;;  %s155_s1 = inlined_call_operand.hbm [shape: f32[16,128], index: 1, kind: output, shape index: {}]  }
   0x1   :  { %7 = vsyncpa [#allocation4], 0  ;;  %s110_s6 = smov [#allocation2]   ;;  %s62_s10 = scalar_lea.hbm %s154_s0, 256 }
   0x2   :  { %s13_s7 = sshll.u32 %s110_s6, 4  ;;  %p63_p0 = scmp.ne.s32.totalorder %s154_s0, %s62_s10  ;;  %s14_s7 = int_to_ptr.vmem [resolvable:$true] %s13_s7 }
   0x3   :  { %p66_p1 = scmp.lt.u32.totalorder %s62_s10, %s154_s0 }
   0x5   :  { %p68_p2 = pnand %p66_p1, %p63_p0 }
   0x7   :  { %71 = shalt.err (!%p68_p2)
}
   0x8   :  { %s72_s15 = scalar_lea.vmem %s14_s7, 256  ;;  %p77_p4 = scmp.lt.s32.totalorder %s14_s7, %s14_s7 }
   0x9   :  { %p73_p3 = scmp.ne.s32.totalorder %s14_s7, %s72_s15  ;;  %p78_p5 = scmp.lt.s32.totalorder %s72_s15, %s72_s15 }
   0xb   :  { %p79_p6 = por %p78_p5, %p77_p4 }
   0xd   :  { %p80_p7 = pnand %p79_p6, %p73_p3 }
   0xf   :  { %83 = shalt.err (!%p80_p7)
}
  0x10   :  { %s111_s16 = smov 128   ;;  %s112_s17 = smov 8  }
  0x11   :  { %19 = dma.hbm_to_vmem [thread:$0]  %s154_s0, 256, %s14_s7, [#allocation3], %s111_s16, %s111_s16, %s112_s17  }
  0x12   :  { %106 = dma.done.wait [#allocation3], 256  }
  0x13   :  { %107 = vsyncadd [#allocation3], 4294967040  ;;  %v23_v0 = vld [vmem:[#allocation2] sm:$0xff]  ;;  %v24_v1 = vld [vmem:[#allocation2 + $0x8] sm:$0xff]  ;;  %s113_s20 = smov [#allocation5]  }
  0x14   :  { %v25_v2 = vmul.f32 0.5, %v23_v0  ;;  %v26_v3 = vmul.f32 0.5, %v24_v1  ;;  %s42_s21 = sshll.u32 %s113_s20, 4  ;;  %s43_s21 = int_to_ptr.vmem [resolvable:$true] %s42_s21 }
  0x15   :  { %s84_s0 = scalar_lea.vmem %s43_s21, 256  ;;  %p89_p9 = scmp.lt.s32.totalorder %s43_s21, %s43_s21 }
  0x16   :  { %58 = vtanh.f32 %v25_v2  ;;  %p85_p8 = scmp.ne.s32.totalorder %s43_s21, %s84_s0  ;;  %p90_p10 = scmp.lt.s32.totalorder %s84_s0, %s84_s0 }
  0x17   :  { %60 = vtanh.f32 %v26_v3 }
  0x18   :  { %p91_p11 = por %p90_p10, %p89_p9 }
  0x1a   :  { %p92_p12 = pnand %p91_p11, %p85_p8 }
  0x20   :  { %v59_v4 = vpop.eup %58 }
  0x21   :  { %v61_v5 = vpop.eup %60  ;;  %v29_v6 = vadd.f32 1.0, %v59_v4 }
  0x22   :  { %v30_v7 = vadd.f32 1.0, %v61_v5 }
  0x23   :  { %v31_v8 = vmul.f32 0.5, %v29_v6 }
  0x24   :  { %v32_v9 = vmul.f32 0.5, %v30_v7 }
  0x25   :  { %v33_v10 = vmul.f32 %v31_v8, %v23_v0 }
  0x26   :  { %v34_v11 = vmul.f32 %v32_v9, %v24_v1 }
  0x27   :  { %35 = vst [vmem:[#allocation5] sm:$0xff] %v33_v10 }
  0x28   :  { %36 = vst [vmem:[#allocation5 + $0x8] sm:$0xff] %v34_v11 }
  0x29   :  { %95 = shalt.err (!%p92_p12)
}
  0x2a   :  { %s96_s24 = scalar_lea.hbm %s155_s1, 256 }
  0x2b   :  { %p97_p13 = scmp.ne.s32.totalorder %s155_s1, %s96_s24  ;;  %p100_p0 = scmp.lt.u32.totalorder %s96_s24, %s155_s1 }
  0x2d   :  { %p102_p1 = pnand %p100_p0, %p97_p13 }
  0x2f   :  { %105 = shalt.err (!%p102_p1)
}
  0x30   :  { %48 = dma.vmem_to_hbm [thread:$0]  %s43_s21, 256, %s155_s1, [#allocation4], %s111_s16, %s111_s16, %s112_s17  }
  0x31   :  { %108 = dma.done.wait [#allocation4], 256  }
  0x32   :  { %109 = vsyncadd [#allocation4], 4294967040 }
  0x33   :  { %52 = vsyncpa [#allocation3], 1 }
  0x34   :  { %53 = vsyncpa [#allocation4], 1 }

</bundles_post_ra>
